<compile_context>
chip_gen: v7x
topology: tpu7x:2x2x1
jax: 0.10.0
libtpu: 0.0.40
codegen_flags: <defaults>
</compile_context>

<pallas_src>
import functools

import jax
import jax.numpy as jnp
from jax.experimental import pallas as pl
from jax.experimental.pallas import tpu as pltpu


def _choose_tb(batch):
    """Power-of-two batch tile (avoids retrace per distinct batch size),
    capped at 1024, with >=2 grid programs once batch > 8 (v7x has 2 TCs)."""
    if batch <= 8:
        return 8
    half = -(-batch // 2)
    tb = 8
    while tb < half:
        tb *= 2
    return min(tb, 1024)


# ------------------------------ step kernels --------------------------------

def _make_step_kernel(has_d):
    def kernel(*refs):
        if has_d:
            x_ref, u_ref, d_ref, wx_ref, wu_ref, wd_ref, b_ref, o_ref = refs
        else:
            x_ref, u_ref, wx_ref, wu_ref, b_ref, o_ref = refs
        acc = jnp.dot(x_ref[...], wx_ref[...], preferred_element_type=jnp.float32)
        acc = acc + jnp.dot(u_ref[...], wu_ref[...], preferred_element_type=jnp.float32)
        if has_d:
            acc = acc + jnp.dot(d_ref[...], wd_ref[...],
                                preferred_element_type=jnp.float32)
        o_ref[...] = (acc + b_ref[...]).astype(o_ref.dtype)
    return kernel


@functools.partial(jax.jit, static_argnames=("tb",))
def _ssm_step(x, u, wx, wu, b, *, tb):
    batch, nx = x.shape[0], wx.shape[1]
    nu = u.shape[1]
    grid = (pl.cdiv(batch, tb),)
    return pl.pallas_call(
        _make_step_kernel(False),
        out_shape=jax.ShapeDtypeStruct((batch, nx), x.dtype),
        grid=grid,
        in_specs=[
            pl.BlockSpec((tb, nx), lambda i: (i, 0)),
            pl.BlockSpec((tb, nu), lambda i: (i, 0)),
            pl.BlockSpec(wx.shape, lambda i: (0, 0)),   # VMEM-resident weight
            pl.BlockSpec(wu.shape, lambda i: (0, 0)),
            pl.BlockSpec(b.shape, lambda i: (0, 0)),    # pre-summed bias
        ],
        out_specs=pl.BlockSpec((tb, nx), lambda i: (i, 0)),
        compiler_params=pltpu.CompilerParams(dimension_semantics=("parallel",)),
    )(x, u, wx, wu, b)


@functools.partial(jax.jit, static_argnames=("tb",))
def _ssm_step_d(x, u, d, wx, wu, wd, b, *, tb):
    batch, nx = x.shape[0], wx.shape[1]
    nu, nd = u.shape[1], d.shape[1]
    grid = (pl.cdiv(batch, tb),)
    return pl.pallas_call(
        _make_step_kernel(True),
        out_shape=jax.ShapeDtypeStruct((batch, nx), x.dtype),
        grid=grid,
        in_specs=[
            pl.BlockSpec((tb, nx), lambda i: (i, 0)),
            pl.BlockSpec((tb, nu), lambda i: (i, 0)),
            pl.BlockSpec((tb, nd), lambda i: (i, 0)),
            pl.BlockSpec(wx.shape, lambda i: (0, 0)),
            pl.BlockSpec(wu.shape, lambda i: (0, 0)),
            pl.BlockSpec(wd.shape, lambda i: (0, 0)),
            pl.BlockSpec(b.shape, lambda i: (0, 0)),
        ],
        out_specs=pl.BlockSpec((tb, nx), lambda i: (i, 0)),
        compiler_params=pltpu.CompilerParams(dimension_semantics=("parallel",)),
    )(x, u, d, wx, wu, wd, b)


# ----------------------------- rollout kernels -------------------------------
# Fused T-step recurrence in one pallas_call; x_k lives in a VMEM scratch.

def _make_rollout_kernel(has_d):
    def kernel(*refs):
        if has_d:
            x0_ref, u_ref, d_ref, wx_ref, wu_ref, wd_ref, b_ref, o_ref, xs = refs
        else:
            x0_ref, u_ref, wx_ref, wu_ref, b_ref, o_ref, xs = refs

        @pl.when(pl.program_id(0) == 0)
        def _():
            xs[...] = x0_ref[...].astype(jnp.float32)

        acc = jnp.dot(xs[...].astype(wx_ref.dtype), wx_ref[...],
                      preferred_element_type=jnp.float32)
        acc = acc + jnp.dot(u_ref[0], wu_ref[...], preferred_element_type=jnp.float32)
        if has_d:
            acc = acc + jnp.dot(d_ref[0], wd_ref[...],
                                preferred_element_type=jnp.float32)
        acc = acc + b_ref[...]
        xs[...] = acc                       # carry state in VMEM across steps
        o_ref[0] = acc.astype(o_ref.dtype)  # write x_{k+1} for this timestep
    return kernel


@jax.jit
def _ssm_rollout(x0, u_seq, wx, wu, b):
    t_steps, batch, nu = u_seq.shape
    nx = wx.shape[1]
    return pl.pallas_call(
        _make_rollout_kernel(False),
        out_shape=jax.ShapeDtypeStruct((t_steps, batch, nx), x0.dtype),
        grid=(t_steps,),
        in_specs=[
            pl.BlockSpec((batch, nx), lambda t: (0, 0)),
            pl.BlockSpec((1, batch, nu), lambda t: (t, 0, 0)),
            pl.BlockSpec(wx.shape, lambda t: (0, 0)),
            pl.BlockSpec(wu.shape, lambda t: (0, 0)),
            pl.BlockSpec(b.shape, lambda t: (0, 0)),
        ],
        out_specs=pl.BlockSpec((1, batch, nx), lambda t: (t, 0, 0)),
        scratch_shapes=[pltpu.VMEM((batch, nx), jnp.float32)],
        compiler_params=pltpu.CompilerParams(dimension_semantics=("arbitrary",)),
    )(x0, u_seq, wx, wu, b)


@jax.jit
def _ssm_rollout_d(x0, u_seq, d_seq, wx, wu, wd, b):
    t_steps, batch, nu = u_seq.shape
    nd = d_seq.shape[2]
    nx = wx.shape[1]
    return pl.pallas_call(
        _make_rollout_kernel(True),
        out_shape=jax.ShapeDtypeStruct((t_steps, batch, nx), x0.dtype),
        grid=(t_steps,),
        in_specs=[
            pl.BlockSpec((batch, nx), lambda t: (0, 0)),
            pl.BlockSpec((1, batch, nu), lambda t: (t, 0, 0)),
            pl.BlockSpec((1, batch, nd), lambda t: (t, 0, 0)),
            pl.BlockSpec(wx.shape, lambda t: (0, 0)),
            pl.BlockSpec(wu.shape, lambda t: (0, 0)),
            pl.BlockSpec(wd.shape, lambda t: (0, 0)),
            pl.BlockSpec(b.shape, lambda t: (0, 0)),
        ],
        out_specs=pl.BlockSpec((1, batch, nx), lambda t: (t, 0, 0)),
        scratch_shapes=[pltpu.VMEM((batch, nx), jnp.float32)],
        compiler_params=pltpu.CompilerParams(dimension_semantics=("arbitrary",)),
    )(x0, u_seq, d_seq, wx, wu, wd, b)


# --------------------------------- wrapper -----------------------------------

class SSMPallas:
    """JAX/Pallas mirror of neuromancer SSM with affine (Linear) fx/fu/fd."""

    def __init__(self, nx, nu, nd=0, use_fd=False, key=None, dtype=jnp.float32):
        if key is None:
            key = jax.random.PRNGKey(0)
        self.nx, self.nu, self.nd = nx, nu, nd
        self.use_fd = use_fd and nd > 0
        self.dtype = dtype
        k = jax.random.split(key, 6)
        s = 0.1
        # weights stored as [in_features, out_features] (pre-transposed Linear)
        self.wx = (s * jax.random.normal(k[0], (nx, nx))).astype(dtype)
        self.wu = (s * jax.random.normal(k[1], (nu, nx))).astype(dtype)
        self.bx = (s * jax.random.normal(k[2], (nx,))).astype(dtype)
        self.bu = (s * jax.random.normal(k[3], (nx,))).astype(dtype)
        if self.use_fd:
            self.wd = (s * jax.random.normal(k[4], (nd, nx))).astype(dtype)
            self.bd = (s * jax.random.normal(k[5], (nx,))).astype(dtype)
        else:
            self.wd, self.bd = None, None
        # pre-summed biases (2D so they ride as a tiny VMEM-resident operand)
        self.b_xu = (self.bx + self.bu).reshape(1, nx)
        self.b_xud = ((self.bx + self.bu + self.bd).reshape(1, nx)
                      if self.use_fd else None)

    def __call__(self, x, u, d=None):
        """Single step: x_{k+1} = fx(x) + fu(u) [+ fd(d)], shape [B, nx]."""
        assert x.ndim == 2 and u.ndim == 2
        tb = _choose_tb(x.shape[0])
        dt = x.dtype
        if self.use_fd and d is not None:
            assert d.ndim == 2
            return _ssm_step_d(x, u, d, self.wx.astype(dt), self.wu.astype(dt),
                               self.wd.astype(dt), self.b_xud, tb=tb)
        return _ssm_step(x, u, self.wx.astype(dt), self.wu.astype(dt),
                         self.b_xu, tb=tb)

    def rollout(self, x0, u_seq, d_seq=None):
        """Fused T-step rollout in one pallas_call; returns [T, B, nx]."""
        assert x0.ndim == 2 and u_seq.ndim == 3
        dt = x0.dtype
        if self.use_fd and d_seq is not None:
            assert d_seq.ndim == 3
            return _ssm_rollout_d(x0, u_seq, d_seq, self.wx.astype(dt),
                                  self.wu.astype(dt), self.wd.astype(dt),
                                  self.b_xud)
        return _ssm_rollout(x0, u_seq, self.wx.astype(dt), self.wu.astype(dt),
                            self.b_xu)


# ----------------------------------- main ------------------------------------

if __name__ == "__main__":
    key = jax.random.PRNGKey(0)
    kx, ku, kd, kp, ks, kt = jax.random.split(key, 6)

    B, nx, nu, nd, T = 8, 32, 16, 8, 6
    x = jax.random.normal(kx, (B, nx), dtype=jnp.float32)
    u = jax.random.normal(ku, (B, nu), dtype=jnp.float32)
    d = jax.random.normal(kd, (B, nd), dtype=jnp.float32)

    model = SSMPallas(nx, nu, nd, use_fd=True, key=kp)

    # --- single step, with disturbance ---
    out = jax.block_until_ready(model(x, u, d))
    ref = (x @ model.wx + model.bx) + (u @ model.wu + model.bu) + (d @ model.wd + model.bd)
    assert out.shape == (B, nx)
    assert jnp.allclose(out, ref, atol=1e-5, rtol=1e-5), "mismatch (d path)"

    # --- single step, no disturbance (fd term skipped, like d=None in torch) ---
    out2 = jax.block_until_ready(model(x, u, None))
    ref2 = (x @ model.wx + model.bx) + (u @ model.wu + model.bu)
    assert jnp.allclose(out2, ref2, atol=1e-5, rtol=1e-5), "mismatch (no-d path)"

    # --- fused T-step rollout (time loop inside a single pallas_call) ---
    u_seq = jax.random.normal(ks, (T, B, nu), dtype=jnp.float32)
    d_seq = jax.random.normal(kt, (T, B, nd), dtype=jnp.float32)
    xs = jax.block_until_ready(model.rollout(x, u_seq, d_seq))
    xr, ref_list = x, []
    for t in range(T):
        xr = (xr @ model.wx + model.bx) + (u_seq[t] @ model.wu + model.bu) \
             + (d_seq[t] @ model.wd + model.bd)
        ref_list.append(xr)
    ref_seq = jnp.stack(ref_list)
    assert xs.shape == (T, B, nx)
    assert jnp.allclose(xs, ref_seq, atol=1e-4, rtol=1e-4), "mismatch (rollout d)"

    xs2 = jax.block_until_ready(model.rollout(x, u_seq, None))
    xr, ref_list = x, []
    for t in range(T):
        xr = (xr @ model.wx + model.bx) + (u_seq[t] @ model.wu + model.bu)
        ref_list.append(xr)
    ref_seq2 = jnp.stack(ref_list)
    assert jnp.allclose(xs2, ref_seq2, atol=1e-4, rtol=1e-4), "mismatch (rollout no-d)"

    print("KERNEL_OK")
</pallas_src>

<mosaic_0001>
module attributes {stable_mosaic.version = 11 : i64} {
  func.func @kernel(%arg0: i32, %arg1: memref<8x32xf32, #tpu.memory_space<vmem>>, %arg2: memref<8x16xf32, #tpu.memory_space<vmem>>, %arg3: memref<8x8xf32, #tpu.memory_space<vmem>>, %arg4: memref<32x32xf32, #tpu.memory_space<vmem>>, %arg5: memref<16x32xf32, #tpu.memory_space<vmem>>, %arg6: memref<8x32xf32, #tpu.memory_space<vmem>>, %arg7: memref<1x32xf32, #tpu.memory_space<vmem>>, %arg8: memref<8x32xf32, #tpu.memory_space<vmem>>) attributes {dimension_semantics = [#tpu.dimension_semantics<parallel>], iteration_bounds = array<i64: 1>, scalar_prefetch = 0 : i64, scratch_operands = 0 : i64, tpu.core_type = #tpu.core_type<tc>, window_params = [{transform_indices = @transform_0, window_bounds = array<i64: 8, 32>}, {transform_indices = @transform_1, window_bounds = array<i64: 8, 16>}, {transform_indices = @transform_2, window_bounds = array<i64: 8, 8>}, {pipeline_mode = #tpu.pipeline_mode<synchronous>, transform_indices = @transform_3, window_bounds = array<i64: 32, 32>}, {pipeline_mode = #tpu.pipeline_mode<synchronous>, transform_indices = @transform_4, window_bounds = array<i64: 16, 32>}, {pipeline_mode = #tpu.pipeline_mode<synchronous>, transform_indices = @transform_5, window_bounds = array<i64: 8, 32>}, {pipeline_mode = #tpu.pipeline_mode<synchronous>, transform_indices = @transform_6, window_bounds = array<i64: 1, 32>}, {transform_indices = @transform_7, window_bounds = array<i64: 8, 32>}]} {
    %c0 = arith.constant 0 : index
    %c0_0 = arith.constant 0 : index
    %0 = vector.load %arg1[%c0, %c0_0] : memref<8x32xf32, #tpu.memory_space<vmem>>, vector<8x32xf32>
    %c0_1 = arith.constant 0 : index
    %c0_2 = arith.constant 0 : index
    %1 = vector.load %arg4[%c0_1, %c0_2] : memref<32x32xf32, #tpu.memory_space<vmem>>, vector<32x32xf32>
    %cst = arith.constant dense<0.000000e+00> : vector<8x32xf32>
    %2 = tpu.matmul %0, %1, %cst {dimension_numbers = #tpu.dot_dimension_numbers<[1], [0], [0], [1], [0, 0, 1, 1], [], []>} : vector<8x32xf32>, vector<32x32xf32>, vector<8x32xf32> -> vector<8x32xf32>
    %c0_3 = arith.constant 0 : index
    %c0_4 = arith.constant 0 : index
    %3 = vector.load %arg2[%c0_3, %c0_4] : memref<8x16xf32, #tpu.memory_space<vmem>>, vector<8x16xf32>
    %c0_5 = arith.constant 0 : index
    %c0_6 = arith.constant 0 : index
    %4 = vector.load %arg5[%c0_5, %c0_6] : memref<16x32xf32, #tpu.memory_space<vmem>>, vector<16x32xf32>
    %cst_7 = arith.constant dense<0.000000e+00> : vector<8x32xf32>
    %5 = tpu.matmul %3, %4, %cst_7 {dimension_numbers = #tpu.dot_dimension_numbers<[1], [0], [0], [1], [0, 0, 1, 1], [], []>} : vector<8x16xf32>, vector<16x32xf32>, vector<8x32xf32> -> vector<8x32xf32>
    %6 = arith.addf %2, %5 : vector<8x32xf32>
    %c0_8 = arith.constant 0 : index
    %c0_9 = arith.constant 0 : index
    %7 = vector.load %arg3[%c0_8, %c0_9] : memref<8x8xf32, #tpu.memory_space<vmem>>, vector<8x8xf32>
    %c0_10 = arith.constant 0 : index
    %c0_11 = arith.constant 0 : index
    %8 = vector.load %arg6[%c0_10, %c0_11] : memref<8x32xf32, #tpu.memory_space<vmem>>, vector<8x32xf32>
    %cst_12 = arith.constant dense<0.000000e+00> : vector<8x32xf32>
    %9 = tpu.matmul %7, %8, %cst_12 {dimension_numbers = #tpu.dot_dimension_numbers<[1], [0], [0], [1], [0, 0, 1, 1], [], []>} : vector<8x8xf32>, vector<8x32xf32>, vector<8x32xf32> -> vector<8x32xf32>
    %10 = arith.addf %6, %9 : vector<8x32xf32>
    %c0_13 = arith.constant 0 : index
    %c0_14 = arith.constant 0 : index
    %11 = vector.load %arg7[%c0_13, %c0_14] : memref<1x32xf32, #tpu.memory_space<vmem>>, vector<1x32xf32>
    %12 = vector.broadcast %11 : vector<1x32xf32> to vector<8x32xf32>
    %13 = arith.addf %10, %12 : vector<8x32xf32>
    %c0_15 = arith.constant 0 : index
    %c0_16 = arith.constant 0 : index
    %14 = vector.load %arg8[%c0_15, %c0_16] : memref<8x32xf32, #tpu.memory_space<vmem>>, vector<8x32xf32>
    tpu.vector_store %arg8[%c0_15, %c0_16], %13 {strides = array<i32>} : memref<8x32xf32, #tpu.memory_space<vmem>>, vector<8x32xf32>,
    return
  }
  func.func @transform_0(%arg0: i32) -> (i32, i32) {
    %c0_i32 = arith.constant 0 : i32
    %c0_i32_0 = arith.constant 0 : i32
    return %arg0, %c0_i32 : i32, i32
  }
  func.func @transform_1(%arg0: i32) -> (i32, i32) {
    %c0_i32 = arith.constant 0 : i32
    %c0_i32_0 = arith.constant 0 : i32
    return %arg0, %c0_i32 : i32, i32
  }
  func.func @transform_2(%arg0: i32) -> (i32, i32) {
    %c0_i32 = arith.constant 0 : i32
    %c0_i32_0 = arith.constant 0 : i32
    return %arg0, %c0_i32 : i32, i32
  }
  func.func @transform_3(%arg0: i32) -> (i32, i32) {
    %c0_i32 = arith.constant 0 : i32
    %c0_i32_0 = arith.constant 0 : i32
    %c0_i32_1 = arith.constant 0 : i32
    return %c0_i32, %c0_i32_0 : i32, i32
  }
  func.func @transform_4(%arg0: i32) -> (i32, i32) {
    %c0_i32 = arith.constant 0 : i32
    %c0_i32_0 = arith.constant 0 : i32
    %c0_i32_1 = arith.constant 0 : i32
    return %c0_i32, %c0_i32_0 : i32, i32
  }
  func.func @transform_5(%arg0: i32) -> (i32, i32) {
    %c0_i32 = arith.constant 0 : i32
    %c0_i32_0 = arith.constant 0 : i32
    %c0_i32_1 = arith.constant 0 : i32
    return %c0_i32, %c0_i32_0 : i32, i32
  }
  func.func @transform_6(%arg0: i32) -> (i32, i32) {
    %c0_i32 = arith.constant 0 : i32
    %c0_i32_0 = arith.constant 0 : i32
    %c0_i32_1 = arith.constant 0 : i32
    return %c0_i32, %c0_i32_0 : i32, i32
  }
  func.func @transform_7(%arg0: i32) -> (i32, i32) {
    %c0_i32 = arith.constant 0 : i32
    %c0_i32_0 = arith.constant 0 : i32
    return %arg0, %c0_i32 : i32, i32
  }
}

</mosaic_0001>

<bundles_post_ra>
// kernel: _ssm_step_d.1
= control target key start
LH: loop header
LB: loop body
LE: loop exit
PB: predicated region body
PF: predicated region fallthrough
CT: control target
= control target key end

     0   :  { %12 = vsyncpa [#allocation3], 0  ;;  %s692_s0 = inlined_call_operand.hbm [shape: f32[8,32], index: 0, kind: input, shape index: {}]   ;;  %s693_s1 = inlined_call_operand.hbm [shape: f32[8,16], index: 1, kind: input, shape index: {}]   ;;  %s694_s2 = inlined_call_operand.hbm [shape: f32[8,8], index: 2, kind: input, shape index: {}]   ;;  %s695_s3 = inlined_call_operand.hbm [shape: f32[32,32], index: 3, kind: input, shape index: {}]   ;;  %s696_s4 = inlined_call_operand.hbm [shape: f32[16,32], index: 4, kind: input, shape index: {}]   ;;  %s697_s5 = inlined_call_operand.vmem [shape: f32[8,32], index: 5, kind: input, shape index: {}]   ;;  %s698_s6 = inlined_call_operand.vmem [shape: f32[1,32], index: 6, kind: input, shape index: {}]   ;;  %s699_s7 = inlined_call_operand.hbm [shape: f32[8,32], index: 7, kind: output, shape index: {}]  }
   0x1   :  { %13 = vsyncpa [#allocation6], 0 }
   0x2   :  { %14 = vsyncpa [#allocation9], 0 }
   0x3   :  { %15 = vsyncpa [#allocation4], 0  ;;  %s545_s24 = smov [#allocation5]   ;;  %s546_s26 = smov [#allocation8]  }
   0x4   :  { %s32_s25 = sshll.u32 %s545_s24, 4  ;;  %s51_s27 = sshll.u32 %s546_s26, 4  ;;  %s33_s25 = int_to_ptr.vmem [resolvable:$true] %s32_s25  ;;  %s596_s27 = int_to_ptr.vmem [resolvable:$true] %s51_s27 }
   0x5   :  { %s405_s30 = scalar_lea.hbm %s693_s1, 128 }
   0x6   :  { %p406_p0 = scmp.ne.s32.totalorder %s693_s1, %s405_s30  ;;  %p409_p1 = scmp.lt.u32.totalorder %s405_s30, %s693_s1 }
   0x8   :  { %p411_p2 = pnand %p409_p1, %p406_p0 }
   0xa   :  { %414 = shalt.err (!%p411_p2)
}
   0xb   :  { %s415_s12 = scalar_lea.vmem %s33_s25, 128  ;;  %p420_p4 = scmp.lt.s32.totalorder %s33_s25, %s33_s25 }
   0xc   :  { %p416_p3 = scmp.ne.s32.totalorder %s33_s25, %s415_s12  ;;  %p421_p5 = scmp.lt.s32.totalorder %s415_s12, %s415_s12 }
   0xe   :  { %p422_p6 = por %p421_p5, %p420_p4 }
  0x10   :  { %p423_p7 = pnand %p422_p6, %p416_p3 }
  0x12   :  { %426 = shalt.err (!%p423_p7)
}
  0x13   :  { %35 = dma.hbm_to_vmem [thread:$0]  %s693_s1, 128, %s33_s25, [#allocation6]  }
  0x14   :  { %s427_s17 = scalar_lea.hbm %s695_s3, 512 }
  0x15   :  { %p428_p8 = scmp.ne.s32.totalorder %s695_s3, %s427_s17  ;;  %p431_p9 = scmp.lt.u32.totalorder %s427_s17, %s695_s3 }
  0x17   :  { %p433_p10 = pnand %p431_p9, %p428_p8 }
  0x19   :  { %436 = shalt.err (!%p433_p10)
}
  0x1a   :  { %s437_s22 = scalar_lea.vmem %s596_s27, 512  ;;  %p442_p12 = scmp.lt.s32.totalorder %s596_s27, %s596_s27 }
  0x1b   :  { %p438_p11 = scmp.ne.s32.totalorder %s596_s27, %s437_s22  ;;  %p443_p13 = scmp.lt.s32.totalorder %s437_s22, %s437_s22 }
  0x1d   :  { %p444_p0 = por %p443_p13, %p442_p12 }
  0x1f   :  { %p445_p1 = pnand %p444_p0, %p438_p11 }
  0x21   :  { %448 = shalt.err (!%p445_p1)
}
  0x22   :  { %s547_s1 = smov 128   ;;  %s548_s23 = smov 8  }
  0x23   :  { %57 = dma.hbm_to_vmem [thread:$0]  %s695_s3, 512, %s596_s27, [#allocation9], %s547_s1, %s547_s1, %s548_s23  }
  0x24   :  { %s549_s26 = smov [#allocation2]   ;;  %s550_s29 = smov [#allocation7]  }
  0x25   :  { %s22_s28 = sshll.u32 %s549_s26, 4  ;;  %s42_s30 = sshll.u32 %s550_s29, 4  ;;  %s23_s28 = int_to_ptr.vmem [resolvable:$true] %s22_s28  ;;  %s43_s30 = int_to_ptr.vmem [resolvable:$true] %s42_s30 }
  0x26   :  { %s449_s10 = scalar_lea.hbm %s692_s0, 128 }
  0x27   :  { %p450_p2 = scmp.ne.s32.totalorder %s692_s0, %s449_s10  ;;  %p453_p3 = scmp.lt.u32.totalorder %s449_s10, %s692_s0 }
  0x29   :  { %p455_p4 = pnand %p453_p3, %p450_p2 }
  0x2b   :  { %458 = shalt.err (!%p455_p4)
}
  0x2c   :  { %s459_s3 = scalar_lea.vmem %s23_s28, 128  ;;  %p464_p6 = scmp.lt.s32.totalorder %s23_s28, %s23_s28 }
  0x2d   :  { %p460_p5 = scmp.ne.s32.totalorder %s23_s28, %s459_s3  ;;  %p465_p7 = scmp.lt.s32.totalorder %s459_s3, %s459_s3 }
  0x2f   :  { %p466_p8 = por %p465_p7, %p464_p6 }
  0x31   :  { %p467_p9 = pnand %p466_p8, %p460_p5 }
  0x33   :  { %470 = shalt.err (!%p467_p9)
}
  0x34   :  { %25 = dma.hbm_to_vmem [thread:$0]  %s692_s0, 128, %s23_s28, [#allocation3]  }
  0x35   :  { %s471_s18 = scalar_lea.hbm %s694_s2, 128 }
  0x36   :  { %p472_p10 = scmp.ne.s32.totalorder %s694_s2, %s471_s18  ;;  %p475_p11 = scmp.lt.u32.totalorder %s471_s18, %s694_s2 }
  0x38   :  { %p477_p12 = pnand %p475_p11, %p472_p10 }
  0x3a   :  { %480 = shalt.err (!%p477_p12)
}
  0x3b   :  { %s481_s24 = scalar_lea.vmem %s43_s30, 128  ;;  %p486_p0 = scmp.lt.s32.totalorder %s43_s30, %s43_s30 }
  0x3c   :  { %p482_p13 = scmp.ne.s32.totalorder %s43_s30, %s481_s24  ;;  %p487_p1 = scmp.lt.s32.totalorder %s481_s24, %s481_s24 }
  0x3e   :  { %p488_p2 = por %p487_p1, %p486_p0 }
  0x40   :  { %p489_p3 = pnand %p488_p2, %p482_p13 }
  0x42   :  { %492 = shalt.err (!%p489_p3)
}
  0x43   :  { %45 = dma.hbm_to_vmem [thread:$0]  %s694_s2, 128, %s43_s30, [#allocation6]  }
  0x44   :  { %s551_s26 = smov [#allocation10]   ;;  %s493_s9 = scalar_lea.hbm %s696_s4, 256 }
  0x45   :  { %s63_s28 = sshll.u32 %s551_s26, 4  ;;  %p494_p4 = scmp.ne.s32.totalorder %s696_s4, %s493_s9  ;;  %s64_s28 = int_to_ptr.vmem [resolvable:$true] %s63_s28 }
  0x46   :  { %p497_p5 = scmp.lt.u32.totalorder %s493_s9, %s696_s4 }
  0x48   :  { %p499_p6 = pnand %p497_p5, %p494_p4 }
  0x4a   :  { %502 = shalt.err (!%p499_p6)
}
  0x4b   :  { %s503_s14 = scalar_lea.vmem %s64_s28, 256  ;;  %p508_p8 = scmp.lt.s32.totalorder %s64_s28, %s64_s28 }
  0x4c   :  { %p504_p7 = scmp.ne.s32.totalorder %s64_s28, %s503_s14  ;;  %p509_p9 = scmp.lt.s32.totalorder %s503_s14, %s503_s14 }
  0x4e   :  { %p510_p10 = por %p509_p9, %p508_p8 }
  0x50   :  { %p511_p11 = pnand %p510_p10, %p504_p7 }
  0x52   :  { %514 = shalt.err (!%p511_p11)
}
  0x53   :  { %69 = dma.hbm_to_vmem [thread:$0]  %s696_s4, 256, %s64_s28, [#allocation9], %s547_s1, %s547_s1, %s548_s23  }
  0x54   :  { %537 = dma.done.wait [#allocation3], 128  }
  0x55   :  { %538 = vsyncadd [#allocation3], 4294967168 }
  0x56   :  { %539 = dma.done.wait [#allocation6], 256  }
  0x57   :  { %540 = vsyncadd [#allocation6], 4294967040 }
  0x58   :  { %541 = dma.done.wait [#allocation9], 768  }
  0x59   :  { %542 = vsyncadd [#allocation9], 4294966528  ;;  %v552_v0 = vmov 0.0|0.0   ;;  %vm553_vm0 = vmmov 0   ;;  %v554_v1 = vmov 0.0   ;;  %v90_v2 = vld [vmem:[#allocation8] sm:$0xff] }
  0x5a   :  { %388 = vmatprep.subr.bf16.mxu1 %v552_v0  ;;  %385 = vmatprep.subr.bf16.mxu0 %v552_v0  ;;  %v91_v3 = vld [vmem:[#allocation8 + $0x8] sm:$0xff]  ;;  %v95_v4 = vld [vmem:[#allocation10] sm:$0xff]  ;;  %v92_v7 = vld [vmem:[#allocation8 + $0x10] sm:$0xff]  ;;  %vm97_vm1 = vcmask 130048   ;;  %vm171_vm2 = vcmask 261120   ;;  %vm247_vm3 = vcmask 64512  }
  0x5b   :  { %366 = vmatprep.mubr.msk.f32.mxu0 %vm553_vm0, %v554_v1  ;;  %377 = vmatprep.mubr.msk.f32.mxu1 %vm553_vm0, %v554_v1  ;;  %v389_v5 = vpack.c.bf16 %v91_v3, %v90_v2  ;;  %v96_v6 = vld [vmem:[#allocation10 + $0x8] sm:$0xff]  ;;  %v93_v9 = vld [vmem:[#allocation8 + $0x18] sm:$0xff]  ;;  %v94_v11 = vld [vmem:[#allocation5] sm:$0xff]  ;;  %s555_s3 = smov [#allocation11]  }
  0x5c   :  { %v386_v8 = vpack.c.bf16 %v96_v6, %v95_v4  ;;  %v392_v10 = vpack.c.bf16 %v93_v9, %v92_v7  ;;  %v246_v12 = vld [vmem:[%s697_s5] sm:$0xff]  ;;  %v245_v14 = vld [vmem:[#allocation7] sm:$0xff]  ;;  %s337_s27 = sshll.u32 %s555_s3, 4  ;;  %s338_s27 = int_to_ptr.vmem [resolvable:$true] %s337_s27 }
  0x5d   :  { %390 = vmatpush3.bf16.msra.mxu1 %v389_v5  ;;  %v89_v13 = vld [vmem:[#allocation2] sm:$0xff]  ;;  %s515_s15 = scalar_lea.vmem %s338_s27, 128  ;;  %p520_p13 = scmp.lt.s32.totalorder %s338_s27, %s338_s27 }
  0x5e   :  { %387 = vmatpush3.bf16.msra.mxu0 %v386_v8  ;;  %391 = vmatprep.subr.bf16.mxu1 %v552_v0  ;;  %v351_v21 = vld [vmem:[%s698_s6] ss:$0 sm:$0xff]  ;;  %p516_p12 = scmp.ne.s32.totalorder %s338_s27, %s515_s15  ;;  %p521_p0 = scmp.lt.s32.totalorder %s515_s15, %s515_s15 }
  0x5f   :  { %380 = vmatprep.subr.mxu0 %v554_v1 }
  0x60   :  { %p522_p1 = por %p521_p0, %p520_p13 }
  0x61   :  { %367 = vmatmul.mubr.msk.f32.vlgmr.msra.gmra.mrb[0].mxu0 %vm97_vm1, %v94_v11  ;;  %393 = vmatpush3.bf16.msra.mxu1 %v392_v10 }
  0x62   :  { %381 = vmatpush3.msra.mxu0 %v246_v12  ;;  %382 = vmatprep.mubr.msk.f32.mxu0 %vm553_vm0, %v554_v1  ;;  %p523_p2 = pnand %p522_p1, %p516_p12 }
  0x64   :  { %378 = vmatmul.mubr.msk.f32.vlgmr.msra.gmra.mrb[0].mxu1 %vm171_vm2, %v89_v13 }
  0x65   :  { %383 = vmatmul.mubr.msk.f32.vlgmr.msra.gmra.mrb[2].mxu0 %vm247_vm3, %v245_v14 }
 0x134   :  { %v167_v15 = vpop.f32.mrb[0].mxu0 }
 0x135   :  { %v368_v16 = vpop.f32.mrb[1].mxu0 }
 0x137   :  { %v241_v17 = vpop.f32.mrb[0].mxu1 }
 0x138   :  { %v242_v18 = vadd.f32 %v241_v17, %v167_v15  ;;  %v379_v19 = vpop.f32.mrb[1].mxu1  ;;  %v317_v20 = vpop.f32.mrb[2].mxu0 }
 0x139   :  { %v384_v22 = vpop.f32.mrb[3].mxu0 }
 0x13a   :  { %v321_v23 = vadd.f32 %v317_v20, %v242_v18 }
 0x13c   :  { %v329_v24 = vadd.f32 %v351_v21, %v321_v23 }
 0x13e   :  { %330 = vst.msk [vmem:[#allocation11] sm:$0xff] %vm171_vm2, %v329_v24 }
 0x13f   :  { %526 = shalt.err (!%p523_p2)
}
 0x140   :  { %s527_s18 = scalar_lea.hbm %s699_s7, 128 }
 0x141   :  { %p528_p3 = scmp.ne.s32.totalorder %s699_s7, %s527_s18  ;;  %p531_p4 = scmp.lt.u32.totalorder %s527_s18, %s699_s7 }
 0x143   :  { %p533_p5 = pnand %p531_p4, %p528_p3 }
 0x145   :  { %536 = shalt.err (!%p533_p5)
}
 0x146   :  { %340 = dma.vmem_to_hbm [thread:$0]  %s338_s27, 128, %s699_s7, [#allocation4]  }
 0x147   :  { %543 = dma.done.wait [#allocation4], 128  }
 0x148   :  { %544 = vsyncadd [#allocation4], 4294967168 }
 0x149   :  { %344 = vsyncpa [#allocation3], 1 }
 0x14a   :  { %345 = vsyncpa [#allocation6], 1 }
 0x14b   :  { %346 = vsyncpa [#allocation9], 1 }
 0x14c   :  { %347 = vsyncpa [#allocation4], 1 }

</bundles_post_ra>
